<compile_context>
chip_gen: v7x
topology: tpu7x:2x2x1
jax: 0.10.0
libtpu: 0.0.40
codegen_flags: <defaults>
</compile_context>

<pallas_src>
import math
from functools import lru_cache, partial

import jax
import jax.numpy as jnp
import numpy as np
from jax.experimental import pallas as pl
from jax.experimental.pallas import tpu as pltpu


# ------------------------- chip / capability probes -------------------------
def _device_kind():
    try:
        return jax.devices()[0].device_kind.lower()
    except Exception:
        return ""


def _is_v7():
    k = _device_kind()
    return ("v7" in k) or ("7x" in k)


def _vmem_budget_bytes():
    # v7x has 64 MiB VMEM per TensorCore; earlier generations have 128 MiB.
    return (44 << 20) if _is_v7() else (100 << 20)


@lru_cache(maxsize=None)
def _int8_mxu_ok():
    """Probe: f32->int8 quant casts + int8 x int8 -> int32 MXU dot lower & run here?"""
    def kern(x_ref, w_ref, o_ref):
        xq = jnp.clip(jnp.round(x_ref[...]), -128.0, 127.0)
        xq = xq.astype(jnp.int32).astype(jnp.int8)
        acc = jnp.dot(xq, w_ref[...], preferred_element_type=jnp.int32)
        o_ref[...] = acc.astype(jnp.float32)

    try:
        x = jnp.full((32, 128), 2.0, jnp.float32)
        w = jnp.ones((128, 128), jnp.int8)
        out = pl.pallas_call(
            kern, out_shape=jax.ShapeDtypeStruct((32, 128), jnp.float32))(x, w)
        out = jax.block_until_ready(out)
        return bool(abs(float(out[0, 0]) - 256.0) < 0.5)
    except Exception:
        return False


@lru_cache(maxsize=None)
def _int8_weight_upcast_ok():
    """Probe: int8-in-HBM weight upcast to bf16 inside the kernel (halves weight DMA)."""
    def kern(x_ref, w_ref, o_ref):
        o_ref[...] = jnp.dot(x_ref[...], w_ref[...].astype(jnp.bfloat16),
                             preferred_element_type=jnp.float32)

    try:
        x = jnp.ones((16, 128), jnp.bfloat16)
        w = jnp.ones((128, 128), jnp.int8)
        out = pl.pallas_call(
            kern, out_shape=jax.ShapeDtypeStruct((16, 128), jnp.float32))(x, w)
        out = jax.block_until_ready(out)
        return bool(abs(float(out[0, 0]) - 128.0) < 0.5)
    except Exception:
        return False


@lru_cache(maxsize=None)
def _compute_mode():
    """'int8' -> int8 operands, i32 MXU accumulation (v5e/v6e).
       'w8'   -> int8 weights in HBM upcast to bf16 in-kernel, bf16 MXU (v7x).
       'bf16' -> bf16 weights in HBM, bf16 MXU (safe fallback)."""
    if (not _is_v7()) and _int8_mxu_ok():
        return "int8"
    if _int8_weight_upcast_ok():
        return "w8"
    return "bf16"


# -------------------- init-time glue (plain JAX, run once) -----------------
def quantize_weight(weight, eps=1e-5):
    """Ternary (1.58-bit) weight quantization done once at module build time."""
    scale = jnp.maximum(jnp.mean(jnp.abs(weight)), eps)
    wq = jnp.clip(jnp.round(weight / scale), -1.0, 1.0)
    return wq, scale


def prepare_weight(quantized_weight):
    """(out, in) ternary -> (in, out) in the smallest dtype this chip's matmul path
    supports (int8 storage = 1/4 of the f32 weight HBM traffic).  Run once."""
    wt = jnp.asarray(quantized_weight).T
    if _compute_mode() in ("int8", "w8"):
        return wt.astype(jnp.int8)
    return wt.astype(jnp.bfloat16)


# ------------------------------- small helpers ------------------------------
def _round_up(x, m):
    return (x + m - 1) // m * m


def _fit_tile(target, total, unit):
    """Largest tile <= target (multiple of `unit`) that pads `total` minimally."""
    target = max(unit, min(target, total))
    nblk = -(-total // target)
    return _round_up(-(-total // nblk), unit)


# ---------- kernel 1: global abs-max reduction over the input ---------------
def _absmax_kernel(x_ref, gamma_ref, run_ref, *, eps):
    i = pl.program_id(0)
    j = pl.program_id(1)

    @pl.when((i == 0) & (j == 0))
    def _():
        run_ref[...] = jnp.zeros_like(run_ref)

    ax = jnp.abs(x_ref[...]).astype(jnp.float32)
    # Fold the (tm, tk) tile into the (8, tk) running max with pure-VPU maxima
    # (static 8-row slices, no relayout); cross-lane reduce only on the last step.
    m = run_ref[...]
    for s in range(0, ax.shape[0], 8):
        m = jnp.maximum(m, ax[s:s + 8, :])
    run_ref[...] = m

    @pl.when((i == pl.num_programs(0) - 1) & (j == pl.num_programs(1) - 1))
    def _():
        g = jnp.max(run_ref[...], axis=1, keepdims=True)   # (8, 1)
        g = jnp.max(g, axis=0, keepdims=True)               # (1, 1)
        gamma_ref[...] = jnp.maximum(g, jnp.float32(eps))


# ---------- kernel 2: one-shot activation quantization ----------------------
def _quantize_kernel(gamma_ref, x_ref, xq_ref, *, q):
    qf = jnp.float32(q)
    gamma = gamma_ref[0, 0]
    xf = x_ref[...].astype(jnp.float32)
    # same op order as torch: round(clip((x * Q) / gamma))  -> bit-exact quantization
    xq = jnp.clip(jnp.round((xf * qf) / gamma), -qf, qf - 1.0)
    if jnp.dtype(xq_ref.dtype) == jnp.dtype(jnp.int8):
        xq_ref[...] = xq.astype(jnp.int32).astype(jnp.int8)
    else:
        xq_ref[...] = xq.astype(xq_ref.dtype)


# ---------- kernel 3: (quantize +) matmul + dequant --------------------------
def _matmul_kernel(gamma_ref, scale_ref, x_ref, w_ref, b_ref, o_ref, *acc,
                   q, prequantized, int8_mxu):
    k = pl.program_id(2)
    last = pl.num_programs(2) - 1
    qf = jnp.float32(q)

    if prequantized:
        xq = x_ref[...]                                  # already int8 / bf16 integers
    else:
        gamma = gamma_ref[0, 0]
        xf = x_ref[...].astype(jnp.float32)
        xq = jnp.clip(jnp.round((xf * qf) / gamma), -qf, qf - 1.0)
        xq = (xq.astype(jnp.int32).astype(jnp.int8) if int8_mxu
              else xq.astype(jnp.bfloat16))

    if int8_mxu:
        part = jnp.dot(xq, w_ref[...], preferred_element_type=jnp.int32)
    else:
        # int8->bf16 upcast is a no-op when the weight is already bf16.
        part = jnp.dot(xq, w_ref[...].astype(jnp.bfloat16),
                       preferred_element_type=jnp.float32)

    if acc:                                              # separate accumulator scratch
        acc_ref = acc[0]

        @pl.when(k == 0)
        def _():
            acc_ref[...] = jnp.zeros_like(acc_ref)

        acc_ref[...] += part

        @pl.when(k == last)
        def _():
            dequant = (scale_ref[0, 0] * gamma_ref[0, 0]) / qf
            out = acc_ref[...].astype(jnp.float32) * dequant + b_ref[...].astype(jnp.float32)
            o_ref[...] = out.astype(o_ref.dtype)
    else:                                                # f32 output doubles as accumulator
        @pl.when(k == 0)
        def _():
            o_ref[...] = jnp.zeros_like(o_ref)

        o_ref[...] += part

        @pl.when(k == last)
        def _():
            dequant = (scale_ref[0, 0] * gamma_ref[0, 0]) / qf
            o_ref[...] = o_ref[...] * dequant + b_ref[...].astype(jnp.float32)


# ---------- kernel 4: fused decode / small-prefill path ----------------------
def _fused_kernel(scale_ref, x_ref, w_ref, b_ref, o_ref, xq_ref, gamma_ref, *,
                  q, eps, int8_mxu):
    j = pl.program_id(0)
    qf = jnp.float32(q)

    @pl.when(j == 0)
    def _():
        xf = x_ref[...].astype(jnp.float32)
        g = jnp.max(jnp.abs(xf), axis=1, keepdims=True)
        g = jnp.max(g, axis=0, keepdims=True)            # (1, 1)
        g = jnp.maximum(g, jnp.float32(eps))
        gamma_ref[...] = g
        xq = jnp.clip(jnp.round((xf * qf) / g), -qf, qf - 1.0)
        if jnp.dtype(xq_ref.dtype) == jnp.dtype(jnp.int8):
            xq_ref[...] = xq.astype(jnp.int32).astype(jnp.int8)
        else:
            xq_ref[...] = xq.astype(xq_ref.dtype)

    if int8_mxu:
        acc = jnp.dot(xq_ref[...], w_ref[...],
                      preferred_element_type=jnp.int32).astype(jnp.float32)
    else:
        acc = jnp.dot(xq_ref[...], w_ref[...].astype(jnp.bfloat16),
                      preferred_element_type=jnp.float32)

    dequant = (scale_ref[0, 0] * gamma_ref[...]) / qf    # (1, 1), broadcasts
    o_ref[...] = (acc * dequant + b_ref[...].astype(jnp.float32)).astype(o_ref.dtype)


# ----------------------------- forward wrapper ------------------------------
def bitlinear158_inference(x, wq_t, scale, bias=None, *, bits=8, eps=1e-5,
                           tm=256, tn=1024, tk=2048,
                           allow_fused=True, prequantize=None):
    """x: (..., K) activations; wq_t: (K, N) pre-transposed ternary weight
    (int8 or bf16, see prepare_weight)."""
    *lead, K = x.shape
    Kw, N = wq_t.shape
    assert K == Kw, (K, Kw)
    M = math.prod(lead) if lead else 1
    out_dtype = x.dtype
    x2 = x.reshape(M, K)

    mode = _compute_mode()
    w_is_int8 = jnp.dtype(wq_t.dtype) == jnp.dtype(jnp.int8)
    if w_is_int8 and mode == "bf16":
        # this chip/JAX build cannot consume int8 weights in-kernel; upcast once here
        wq_t = wq_t.astype(jnp.bfloat16)
        w_is_int8 = False
    int8_mxu = bool(w_is_int8 and mode == "int8")
    xq_dtype = jnp.int8 if int8_mxu else jnp.bfloat16
    q = 2 ** (bits - 1)
    budget = _vmem_budget_bytes()

    # f32 accumulation of integer partial sums is exact only below 2**24.
    if not int8_mxu:
        assert K <= (1 << 17), "bf16/f32 accumulation may lose exactness for K > 131072"

    wb = jnp.dtype(wq_t.dtype).itemsize
    xb = jnp.dtype(x2.dtype).itemsize
    ob = jnp.dtype(out_dtype).itemsize
    xqb = jnp.dtype(xq_dtype).itemsize

    M_pad0 = _round_up(M, 32)
    K_pad0 = _round_up(K, 128)
    N_pad0 = _round_up(N, 128)

    scale2 = jnp.reshape(scale, (1, 1)).astype(jnp.float32)

    # -------- fused single-kernel path (x resident in VMEM: decode / small prefill) ----
    fused = False
    tn_f = need_f = None
    if allow_fused and M_pad0 * K_pad0 * xb <= (8 << 20):
        tn_f = _fit_tile(tn, N_pad0, 128)
        for _ in range(16):
            need_f = (2 * M_pad0 * K_pad0 * xb + M_pad0 * K_pad0 * xqb
                      + 2 * (K_pad0 * tn_f * wb + tn_f * 4)
                      + 2 * M_pad0 * tn_f * ob)
            if need_f <= budget or tn_f <= 128:
                break
            tn_f = _fit_tile(tn_f // 2, N_pad0, 128)
        fused = need_f <= budget

    if fused:
        M_pad, K_pad = M_pad0, K_pad0
        N_pad = _round_up(N_pad0, tn_f)
        x2p = jnp.pad(x2, ((0, M_pad - M), (0, K_pad - K))) if (M_pad, K_pad) != (M, K) else x2
        wp = jnp.pad(wq_t, ((0, K_pad - K), (0, N_pad - N))) if (K_pad, N_pad) != (K, N) else wq_t
        if bias is None:
            b2 = jnp.zeros((1, N_pad), jnp.float32)
        else:
            b2 = jnp.pad(bias.astype(jnp.float32).reshape(1, N), ((0, 0), (0, N_pad - N)))

        gn = N_pad // tn_f
        flops = 2 * M_pad * N_pad * K_pad
        bytes_accessed = (M_pad * K_pad * xb + K_pad * N_pad * wb
                          + M_pad * N_pad * ob + N_pad * 4)
        out2 = pl.pallas_call(
            partial(_fused_kernel, q=q, eps=eps, int8_mxu=int8_mxu),
            out_shape=jax.ShapeDtypeStruct((M_pad, N_pad), out_dtype),
            grid_spec=pl.GridSpec(
                grid=(gn,),
                in_specs=[
                    pl.BlockSpec(memory_space=pltpu.MemorySpace.SMEM),   # scale (1,1)
                    pl.BlockSpec((M_pad, K_pad), lambda j: (0, 0)),      # x (resident)
                    pl.BlockSpec((K_pad, tn_f), lambda j: (0, j)),       # W^T tile
                    pl.BlockSpec((1, tn_f), lambda j: (0, j)),           # bias tile
                ],
                out_specs=pl.BlockSpec((M_pad, tn_f), lambda j: (0, j)),
                scratch_shapes=[
                    pltpu.VMEM((M_pad, K_pad), xq_dtype),                # quantized x
                    pltpu.VMEM((1, 1), jnp.float32),                     # gamma
                ],
            ),
            compiler_params=pltpu.CompilerParams(
                dimension_semantics=("arbitrary",),
                vmem_limit_bytes=int(min(max(need_f + (8 << 20), 32 << 20), budget))),
            cost_estimate=pl.CostEstimate(flops=flops, transcendentals=0,
                                          bytes_accessed=bytes_accessed),
        )(scale2, x2p, wp, b2)
        return out2[:M, :N].reshape(*lead, N)

    # --------------------------- general tiled path ---------------------------
    use_acc = int8_mxu or (jnp.dtype(out_dtype) != jnp.dtype(jnp.float32))
    acc_dtype = jnp.int32 if int8_mxu else jnp.float32

    tm_t = _fit_tile(tm, M_pad0, 32)
    tk_t = _fit_tile(tk, K_pad0, 128)
    tn_t = _fit_tile(tn, N_pad0, 128)

    # pre-quantize only when x would otherwise be re-read/re-rounded for many N tiles
    gn_est = _round_up(N_pad0, tn_t) // tn_t
    if prequantize is None:
        prequantize = bool(gn_est >= 4 and M_pad0 * K_pad0 * xb >= (4 << 20))
    x_mm_bytes = xqb if prequantize else xb

    def _need(tm_, tk_, tn_):
        n = 2 * (tm_ * tk_ * x_mm_bytes + tk_ * tn_ * wb + tn_ * 4) + 2 * tm_ * tn_ * ob
        if use_acc:
            n += tm_ * tn_ * 4
        return n

    for _ in range(16):
        if _need(tm_t, tk_t, tn_t) <= budget:
            break
        if tk_t >= tn_t and tk_t > 128:
            tk_t = _fit_tile(tk_t // 2, K_pad0, 128)
        elif tn_t > 128:
            tn_t = _fit_tile(tn_t // 2, N_pad0, 128)
        elif tm_t > 32:
            tm_t = _fit_tile(tm_t // 2, M_pad0, 32)
        else:
            break

    M_pad = _round_up(M_pad0, tm_t)
    K_pad = _round_up(K_pad0, tk_t)
    N_pad = _round_up(N_pad0, tn_t)
    gm, gk, gn = M_pad // tm_t, K_pad // tk_t, N_pad // tn_t

    # zero padding is exact: padded zeros quantize to 0 and padded W rows/cols are 0
    x2p = jnp.pad(x2, ((0, M_pad - M), (0, K_pad - K))) if (M_pad, K_pad) != (M, K) else x2
    wp = jnp.pad(wq_t, ((0, K_pad - K), (0, N_pad - N))) if (K_pad, N_pad) != (K, N) else wq_t
    if bias is None:
        b2 = jnp.zeros((1, N_pad), jnp.float32)
    else:
        b2 = jnp.pad(bias.astype(jnp.float32).reshape(1, N), ((0, 0), (0, N_pad - N)))

    # ---- pass 1: gamma = clamp(global max |x|, eps) ----
    gamma = pl.pallas_call(
        partial(_absmax_kernel, eps=eps),
        out_shape=jax.ShapeDtypeStruct((1, 1), jnp.float32),
        grid_spec=pl.GridSpec(
            grid=(gm, gk),
            in_specs=[pl.BlockSpec((tm_t, tk_t), lambda i, j: (i, j))],
            out_specs=pl.BlockSpec((1, 1), lambda i, j: (0, 0)),
            scratch_shapes=[pltpu.VMEM((8, tk_t), jnp.float32)],
        ),
        compiler_params=pltpu.CompilerParams(
            dimension_semantics=("arbitrary", "arbitrary")),
    )(x2p)

    # ---- pass 2 (optional): quantize x once into int8/bf16 ----
    if prequantize:
        x_in = pl.pallas_call(
            partial(_quantize_kernel, q=q),
            out_shape=jax.ShapeDtypeStruct((M_pad, K_pad), xq_dtype),
            grid_spec=pl.GridSpec(
                grid=(gm, gk),
                in_specs=[
                    pl.BlockSpec(memory_space=pltpu.MemorySpace.SMEM),   # gamma
                    pl.BlockSpec((tm_t, tk_t), lambda i, k: (i, k)),     # x tile
                ],
                out_specs=pl.BlockSpec((tm_t, tk_t), lambda i, k: (i, k)),
            ),
            compiler_params=pltpu.CompilerParams(
                dimension_semantics=("parallel", "parallel")),
        )(gamma, x2p)
    else:
        x_in = x2p

    # ---- pass 3: matmul + dequant (+ fused quantize when not pre-quantized) ----
    flops = 2 * M_pad * N_pad * K_pad
    bytes_accessed = (gn * M_pad * K_pad * x_mm_bytes + gm * K_pad * N_pad * wb
                      + M_pad * N_pad * ob + N_pad * 4)
    need = _need(tm_t, tk_t, tn_t)
    vmem_limit = int(min(max(need + (8 << 20), 32 << 20), budget))
    scratch = [pltpu.VMEM((tm_t, tn_t), acc_dtype)] if use_acc else []

    out2 = pl.pallas_call(
        partial(_matmul_kernel, q=q, prequantized=prequantize, int8_mxu=int8_mxu),
        out_shape=jax.ShapeDtypeStruct((M_pad, N_pad), out_dtype),
        grid_spec=pl.GridSpec(
            grid=(gm, gn, gk),
            in_specs=[
                pl.BlockSpec(memory_space=pltpu.MemorySpace.SMEM),    # gamma scalar
                pl.BlockSpec(memory_space=pltpu.MemorySpace.SMEM),    # weight scale scalar
                pl.BlockSpec((tm_t, tk_t), lambda i, j, k: (i, k)),   # x / xq tile
                pl.BlockSpec((tk_t, tn_t), lambda i, j, k: (k, j)),   # W^T tile (int8/bf16)
                pl.BlockSpec((1, tn_t), lambda i, j, k: (0, j)),      # bias tile
            ],
            out_specs=pl.BlockSpec((tm_t, tn_t), lambda i, j, k: (i, j)),
            scratch_shapes=scratch,
        ),
        compiler_params=pltpu.CompilerParams(
            dimension_semantics=("parallel", "parallel", "arbitrary"),
            vmem_limit_bytes=vmem_limit),
        cost_estimate=pl.CostEstimate(flops=flops, transcendentals=0,
                                      bytes_accessed=bytes_accessed),
    )(gamma, scale2, x_in, wp, b2)

    return out2[:M, :N].reshape(*lead, N)


# ----------------------------- pure-JAX reference ---------------------------
def _reference(x, wq, scale, bias, bits=8, eps=1e-5):
    q = 2 ** (bits - 1)
    gamma = jnp.maximum(jnp.max(jnp.abs(x)), eps)
    xq = jnp.clip(jnp.round(x * q / gamma), -q, q - 1)
    y = jnp.einsum("...k,nk->...n", xq, wq, precision=jax.lax.Precision.HIGHEST)
    y = y * (scale * gamma / q)
    if bias is not None:
        y = y + bias
    return y


if __name__ == "__main__":
    key = jax.random.PRNGKey(0)

    def run_case(batch, seq, in_features, out_features, k, *, weight_dtype=None, **fwd_kwargs):
        kw, kb, kx = jax.random.split(k, 3)
        bound = 1.0 / math.sqrt(in_features)
        weight = jax.random.uniform(kw, (out_features, in_features), jnp.float32,
                                    -bound, bound)
        bias = jax.random.uniform(kb, (out_features,), jnp.float32, -bound, bound)
        x = jax.random.normal(kx, (batch, seq, in_features), jnp.float32)

        # BitLinear158Inference.__init__: quantize + prep weight once; norm=None path
        wq, scale = quantize_weight(weight, eps=1e-5)
        if weight_dtype is None:
            wq_t = prepare_weight(wq)                       # int8 or bf16 per chip probe
        else:
            wq_t = jnp.asarray(wq).T.astype(weight_dtype)   # explicit override

        out = bitlinear158_inference(x, wq_t, scale, bias=bias, bits=8, eps=1e-5,
                                     **fwd_kwargs)
        out = jax.block_until_ready(out)

        ref = _reference(x, wq, scale, bias)
        assert out.shape == (batch, seq, out_features)
        np.testing.assert_allclose(np.asarray(out), np.asarray(ref),
                                   rtol=1e-4, atol=1e-4)

    keys = jax.random.split(key, 5)
    # 1) decode-ish, tile-multiple shapes -> fused single-kernel path
    run_case(2, 8, 256, 256, keys[0])
    # 2) non-multiple shapes -> fused path with zero padding
    run_case(2, 8, 192, 96, keys[1])
    # 3) general 3-pass path (absmax + fused-quantize matmul), single k/n tile
    run_case(2, 64, 384, 512, keys[2], allow_fused=False)
    # 4) general path with pre-quantized activations + multi-step k accumulation
    run_case(2, 64, 384, 512, keys[3], allow_fused=False, prequantize=True, tn=256, tk=128)
    # 5) same shapes but force bf16-stored weights (exercises the bf16 MXU /
    #    accumulate-into-output path on every chip generation)
    run_case(2, 64, 384, 512, keys[4], allow_fused=False, prequantize=True, tn=256, tk=128,
             weight_dtype=jnp.bfloat16)
    print("KERNEL_OK")
</pallas_src>

<mosaic_0001>
module attributes {stable_mosaic.version = 11 : i64} {
  func.func @kern(%arg0: memref<32x128xf32, #tpu.memory_space<vmem>>, %arg1: memref<128x128xi8, #tpu.memory_space<vmem>>, %arg2: memref<32x128xf32, #tpu.memory_space<vmem>>) attributes {dimension_semantics = [], scalar_prefetch = 0 : i64, scratch_operands = 0 : i64, tpu.core_type = #tpu.core_type<tc>} {
    %c0 = arith.constant 0 : index
    %c0_0 = arith.constant 0 : index
    %0 = vector.load %arg0[%c0, %c0_0] : memref<32x128xf32, #tpu.memory_space<vmem>>, vector<32x128xf32>
    %1 = math.roundeven %0 : vector<32x128xf32>
    %cst = arith.constant -1.280000e+02 : f32
    %cst_1 = arith.constant 1.270000e+02 : f32
    %2 = vector.broadcast %cst : f32 to vector<32x128xf32>
    %3 = arith.maximumf %2, %1 : vector<32x128xf32>
    %4 = vector.broadcast %cst_1 : f32 to vector<32x128xf32>
    %5 = arith.minimumf %4, %3 : vector<32x128xf32>
    %6 = arith.fptosi %5 : vector<32x128xf32> to vector<32x128xi32>
    %7 = arith.trunci %6 : vector<32x128xi32> to vector<32x128xi8>
    %c0_2 = arith.constant 0 : index
    %c0_3 = arith.constant 0 : index
    %8 = vector.load %arg1[%c0_2, %c0_3] : memref<128x128xi8, #tpu.memory_space<vmem>>, vector<128x128xi8>
    %cst_4 = arith.constant dense<0> : vector<32x128xi32>
    %9 = tpu.matmul %7, %8, %cst_4 {dimension_numbers = #tpu.dot_dimension_numbers<[1], [0], [0], [1], [0, 0, 1, 1], [], []>} : vector<32x128xi8>, vector<128x128xi8>, vector<32x128xi32> -> vector<32x128xi32>
    %10 = arith.sitofp %9 : vector<32x128xi32> to vector<32x128xf32>
    %c0_5 = arith.constant 0 : index
    %c0_6 = arith.constant 0 : index
    %11 = vector.load %arg2[%c0_5, %c0_6] : memref<32x128xf32, #tpu.memory_space<vmem>>, vector<32x128xf32>
    tpu.vector_store %arg2[%c0_5, %c0_6], %10 {strides = array<i32>} : memref<32x128xf32, #tpu.memory_space<vmem>>, vector<32x128xf32>,
    return
  }
}

module attributes {stable_mosaic.version = 11 : i64} {
  func.func @kern(%arg0: memref<16x128xbf16, #tpu.memory_space<vmem>>, %arg1: memref<128x128xi8, #tpu.memory_space<vmem>>, %arg2: memref<16x128xf32, #tpu.memory_space<vmem>>) attributes {dimension_semantics = [], scalar_prefetch = 0 : i64, scratch_operands = 0 : i64, tpu.core_type = #tpu.core_type<tc>} {
    %c0 = arith.constant 0 : index
    %c0_0 = arith.constant 0 : index
    %0 = vector.load %arg0[%c0, %c0_0] : memref<16x128xbf16, #tpu.memory_space<vmem>>, vector<16x128xbf16>
    %c0_1 = arith.constant 0 : index
    %c0_2 = arith.constant 0 : index
    %1 = vector.load %arg1[%c0_1, %c0_2] : memref<128x128xi8, #tpu.memory_space<vmem>>, vector<128x128xi8>
    %2 = arith.sitofp %1 : vector<128x128xi8> to vector<128x128xbf16>
    %cst = arith.constant dense<0.000000e+00> : vector<16x128xf32>
    %3 = tpu.matmul %0, %2, %cst {dimension_numbers = #tpu.dot_dimension_numbers<[1], [0], [0], [1], [0, 0, 1, 1], [], []>} : vector<16x128xbf16>, vector<128x128xbf16>, vector<16x128xf32> -> vector<16x128xf32>
    %c0_3 = arith.constant 0 : index
    %c0_4 = arith.constant 0 : index
    %4 = vector.load %arg2[%c0_3, %c0_4] : memref<16x128xf32, #tpu.memory_space<vmem>>, vector<16x128xf32>
    tpu.vector_store %arg2[%c0_3, %c0_4], %3 {strides = array<i32>} : memref<16x128xf32, #tpu.memory_space<vmem>>, vector<16x128xf32>,
    return
  }
}

module attributes {stable_mosaic.version = 11 : i64} {
  func.func @_fused_kernel(%arg0: i32, %arg1: memref<1x1xf32, #tpu.memory_space<smem>>, %arg2: memref<32x256xf32, #tpu.memory_space<vmem>>, %arg3: memref<256x256xbf16, #tpu.memory_space<vmem>>, %arg4: memref<1x256xf32, #tpu.memory_space<vmem>>, %arg5: memref<32x256xf32, #tpu.memory_space<vmem>>, %arg6: memref<32x256xbf16, #tpu.memory_space<vmem>>, %arg7: memref<1x1xf32, #tpu.memory_space<vmem>>) attributes {dimension_semantics = [#tpu.dimension_semantics<arbitrary>], iteration_bounds = array<i64: 1>, scalar_prefetch = 0 : i64, scratch_operands = 2 : i64, tpu.core_type = #tpu.core_type<tc>, window_params = [{transform_indices = @transform_0, window_bounds = array<i64: 1, 1>}, {pipeline_mode = #tpu.pipeline_mode<synchronous>, transform_indices = @transform_1, window_bounds = array<i64: 32, 256>}, {transform_indices = @transform_2, window_bounds = array<i64: 256, 256>}, {transform_indices = @transform_3, window_bounds = array<i64: 1, 256>}, {transform_indices = @transform_4, window_bounds = array<i64: 32, 256>}]} {
    %c0_i32 = arith.constant 0 : i32
    %0 = arith.cmpi eq, %arg0, %c0_i32 : i32
    %1 = arith.extui %0 : i1 to i32
    %cst = arith.constant 1.280000e+02 : f32
    %c0_i32_0 = arith.constant 0 : i32
    %2 = arith.cmpi ne, %1, %c0_i32_0 : i32
    scf.if %2 {
      %c0_14 = arith.constant 0 : index
      %c0_15 = arith.constant 0 : index
      %18 = vector.load %arg2[%c0_14, %c0_15] : memref<32x256xf32, #tpu.memory_space<vmem>>, vector<32x256xf32>
      %19 = math.absf %18 : vector<32x256xf32>
      %cst_16 = arith.constant dense<0xFF800000> : vector<32xf32>
      %20 = vector.multi_reduction <maximumf>, %19, %cst_16 [1] : vector<32x256xf32> to vector<32xf32>
      %21 = vector.shape_cast %20 : vector<32xf32> to vector<32x1xf32>
      %cst_17 = arith.constant dense<0xFF800000> : vector<1xf32>
      %22 = vector.multi_reduction <maximumf>, %21, %cst_17 [0] : vector<32x1xf32> to vector<1xf32>
      %23 = vector.shape_cast %22 : vector<1xf32> to vector<1x1xf32>
      %cst_18 = arith.constant 9.99999974E-6 : f32
      %24 = vector.broadcast %cst_18 : f32 to vector<1x1xf32>
      %25 = arith.maximumf %23, %24 : vector<1x1xf32>
      %c0_19 = arith.constant 0 : index
      %c0_20 = arith.constant 0 : index
      %26 = vector.load %arg7[%c0_19, %c0_20] : memref<1x1xf32, #tpu.memory_space<vmem>>, vector<1x1xf32>
      tpu.vector_store %arg7[%c0_19, %c0_20], %25 {strides = array<i32>} : memref<1x1xf32, #tpu.memory_space<vmem>>, vector<1x1xf32>,
      %27 = vector.broadcast %cst : f32 to vector<32x256xf32>
      %28 = arith.mulf %18, %27 : vector<32x256xf32>
      %29 = vector.broadcast %25 : vector<1x1xf32> to vector<32x256xf32>
      %30 = arith.divf %28, %29 : vector<32x256xf32>
      %31 = math.roundeven %30 : vector<32x256xf32>
      %cst_21 = arith.constant 0.000000e+00 : f32
      %32 = arith.subf %cst_21, %cst : f32
      %cst_22 = arith.constant 1.000000e+00 : f32
      %33 = arith.subf %cst, %cst_22 : f32
      %34 = vector.broadcast %32 : f32 to vector<32x256xf32>
      %35 = arith.maximumf %34, %31 : vector<32x256xf32>
      %36 = vector.broadcast %33 : f32 to vector<32x256xf32>
      %37 = arith.minimumf %36, %35 : vector<32x256xf32>
      %38 = arith.truncf %37 : vector<32x256xf32> to vector<32x256xbf16>
      %c0_23 = arith.constant 0 : index
      %c0_24 = arith.constant 0 : index
      %39 = vector.load %arg6[%c0_23, %c0_24] : memref<32x256xbf16, #tpu.memory_space<vmem>>, vector<32x256xbf16>
      tpu.vector_store %arg6[%c0_23, %c0_24], %38 {strides = array<i32>} : memref<32x256xbf16, #tpu.memory_space<vmem>>, vector<32x256xbf16>,
    } else {
    }
    %c0 = arith.constant 0 : index
    %c0_1 = arith.constant 0 : index
    %3 = vector.load %arg6[%c0, %c0_1] : memref<32x256xbf16, #tpu.memory_space<vmem>>, vector<32x256xbf16>
    %c0_2 = arith.constant 0 : index
    %c0_3 = arith.constant 0 : index
    %4 = vector.load %arg3[%c0_2, %c0_3] : memref<256x256xbf16, #tpu.memory_space<vmem>>, vector<256x256xbf16>
    %cst_4 = arith.constant dense<0.000000e+00> : vector<32x256xf32>
    %5 = tpu.matmul %3, %4, %cst_4 {dimension_numbers = #tpu.dot_dimension_numbers<[1], [0], [0], [1], [0, 0, 1, 1], [], []>} : vector<32x256xbf16>, vector<256x256xbf16>, vector<32x256xf32> -> vector<32x256xf32>
    %c0_5 = arith.constant 0 : index
    %c0_6 = arith.constant 0 : index
    %6 = memref.load %arg1[%c0_5, %c0_6] : memref<1x1xf32, #tpu.memory_space<smem>>
    %c0_7 = arith.constant 0 : index
    %c0_8 = arith.constant 0 : index
    %7 = vector.load %arg7[%c0_7, %c0_8] : memref<1x1xf32, #tpu.memory_space<vmem>>, vector<1x1xf32>
    %8 = vector.broadcast %6 : f32 to vector<1x1xf32>
    %9 = arith.mulf %8, %7 : vector<1x1xf32>
    %cst_9 = arith.constant 1.280000e+02 : f32
    %10 = vector.broadcast %cst_9 : f32 to vector<1x1xf32>
    %11 = arith.divf %9, %10 : vector<1x1xf32>
    %12 = vector.broadcast %11 : vector<1x1xf32> to vector<32x256xf32>
    %13 = arith.mulf %5, %12 : vector<32x256xf32>
    %c0_10 = arith.constant 0 : index
    %c0_11 = arith.constant 0 : index
    %14 = vector.load %arg4[%c0_10, %c0_11] : memref<1x256xf32, #tpu.memory_space<vmem>>, vector<1x256xf32>
    %15 = vector.broadcast %14 : vector<1x256xf32> to vector<32x256xf32>
    %16 = arith.addf %13, %15 : vector<32x256xf32>
    %c0_12 = arith.constant 0 : index
    %c0_13 = arith.constant 0 : index
    %17 = vector.load %arg5[%c0_12, %c0_13] : memref<32x256xf32, #tpu.memory_space<vmem>>, vector<32x256xf32>
    tpu.vector_store %arg5[%c0_12, %c0_13], %16 {strides = array<i32>} : memref<32x256xf32, #tpu.memory_space<vmem>>, vector<32x256xf32>,
    return
  }
  func.func @transform_0(%arg0: i32) -> (i32, i32) {
    %c0_i32 = arith.constant 0 : i32
    %c0_i32_0 = arith.constant 0 : i32
    %c0_i32_1 = arith.constant 0 : i32
    return %c0_i32, %c0_i32_0 : i32, i32
  }
  func.func @transform_1(%arg0: i32) -> (i32, i32) {
    %c0_i32 = arith.constant 0 : i32
    %c0_i32_0 = arith.constant 0 : i32
    %c0_i32_1 = arith.constant 0 : i32
    return %c0_i32, %c0_i32_0 : i32, i32
  }
  func.func @transform_2(%arg0: i32) -> (i32, i32) {
    %c0_i32 = arith.constant 0 : i32
    %c0_i32_0 = arith.constant 0 : i32
    return %c0_i32, %arg0 : i32, i32
  }
  func.func @transform_3(%arg0: i32) -> (i32, i32) {
    %c0_i32 = arith.constant 0 : i32
    %c0_i32_0 = arith.constant 0 : i32
    return %c0_i32, %arg0 : i32, i32
  }
  func.func @transform_4(%arg0: i32) -> (i32, i32) {
    %c0_i32 = arith.constant 0 : i32
    %c0_i32_0 = arith.constant 0 : i32
    return %c0_i32, %arg0 : i32, i32
  }
}

</mosaic_0001>

<bundles_post_ra>
// kernel: tpu_custom_call.1
= control target key start
LH: loop header
LB: loop body
LE: loop exit
PB: predicated region body
PF: predicated region fallthrough
CT: control target
= control target key end

     0   :  { %7 = vsyncpa [#allocation3], 0  ;;  %s353_s0 = inlined_call_operand.hbm [shape: f32[32,128], index: 0, kind: input, shape index: {}]   ;;  %s354_s1 = inlined_call_operand.hbm [shape: s8[128,128], index: 1, kind: input, shape index: {}]   ;;  %s355_s2 = inlined_call_operand.hbm [shape: f32[32,128], index: 2, kind: output, shape index: {}]  }
   0x1   :  { %8 = vsyncpa [#allocation6], 0 }
   0x2   :  { %9 = vsyncpa [#allocation4], 0  ;;  %s288_s9 = smov [#allocation2]   ;;  %s216_s13 = scalar_lea.hbm %s353_s0, 512 }
   0x3   :  { %s15_s10 = sshll.u32 %s288_s9, 4  ;;  %p217_p0 = scmp.ne.s32.totalorder %s353_s0, %s216_s13  ;;  %s16_s10 = int_to_ptr.vmem [resolvable:$true] %s15_s10 }
   0x4   :  { %p220_p1 = scmp.lt.u32.totalorder %s216_s13, %s353_s0 }
   0x6   :  { %p222_p2 = pnand %p220_p1, %p217_p0 }
   0x8   :  { %225 = shalt.err (!%p222_p2)
}
   0x9   :  { %s226_s18 = scalar_lea.vmem %s16_s10, 512  ;;  %p231_p4 = scmp.lt.s32.totalorder %s16_s10, %s16_s10 }
   0xa   :  { %p227_p3 = scmp.ne.s32.totalorder %s16_s10, %s226_s18  ;;  %p232_p5 = scmp.lt.s32.totalorder %s226_s18, %s226_s18 }
   0xc   :  { %p233_p6 = por %p232_p5, %p231_p4 }
   0xe   :  { %p234_p7 = pnand %p233_p6, %p227_p3 }
  0x10   :  { %237 = shalt.err (!%p234_p7)
}
  0x11   :  { %s289_s19 = smov 128   ;;  %s290_s20 = smov 8  }
  0x12   :  { %21 = dma.hbm_to_vmem [thread:$0]  %s353_s0, 512, %s16_s10, [#allocation3], %s289_s19, %s289_s19, %s290_s20  }
  0x13   :  { %s291_s23 = smov [#allocation5]   ;;  %s238_s27 = scalar_lea.hbm %s354_s1, 512 }
  0x14   :  { %s27_s24 = sshll.u32 %s291_s23, 4  ;;  %p239_p8 = scmp.ne.s32.totalorder %s354_s1, %s238_s27  ;;  %s28_s24 = int_to_ptr.vmem [resolvable:$true] %s27_s24 }
  0x15   :  { %p242_p9 = scmp.lt.u32.totalorder %s238_s27, %s354_s1 }
  0x17   :  { %p244_p10 = pnand %p242_p9, %p239_p8 }
  0x19   :  { %247 = shalt.err (!%p244_p10)
}
  0x1a   :  { %s248_s4 = scalar_lea.vmem %s28_s24, 512  ;;  %p253_p12 = scmp.lt.s32.totalorder %s28_s24, %s28_s24 }
  0x1b   :  { %p249_p11 = scmp.ne.s32.totalorder %s28_s24, %s248_s4  ;;  %p254_p13 = scmp.lt.s32.totalorder %s248_s4, %s248_s4 }
  0x1d   :  { %p255_p0 = por %p254_p13, %p253_p12 }
  0x1f   :  { %p256_p1 = pnand %p255_p0, %p249_p11 }
  0x21   :  { %259 = shalt.err (!%p256_p1)
}
  0x22   :  { %33 = dma.hbm_to_vmem [thread:$0]  %s354_s1, 512, %s28_s24, [#allocation6], %s289_s19, %s289_s19, %s290_s20  }
  0x23   :  { %282 = dma.done.wait [#allocation3], 512  }
  0x24   :  { %283 = vsyncadd [#allocation3], 4294966784 }
  0x25   :  { %284 = dma.done.wait [#allocation6], 512  }
  0x26   :  { %285 = vsyncadd [#allocation6], 4294966784  ;;  %v64_v0 = vld [vmem:[#allocation5] sm:$0xff]  ;;  %v65_v3 = vld [vmem:[#allocation5 + $0x8] sm:$0xff]  ;;  %s292_s1 = smov [#allocation7]  }
  0x27   :  { %v70_v1 = vunpack.c.l.s8.bf16 %v64_v0  ;;  %v71_v2 = vunpack.c.h.s8.bf16 %v64_v0  ;;  %v41_v4 = vld [vmem:[#allocation2] sm:$0xff]  ;;  %v42_v5 = vld [vmem:[#allocation2 + $0x8] sm:$0xff]  ;;  %v43_v6 = vld [vmem:[#allocation2 + $0x10] sm:$0xff]  ;;  %v72_v12 = vunpack.c.l.s8.bf16 %v65_v3  ;;  %v73_v19 = vunpack.c.h.s8.bf16 %v65_v3  ;;  %s145_s6 = sshll.u32 %s292_s1, 4  ;;  %s146_s6 = int_to_ptr.vmem [resolvable:$true] %s145_s6 }
  0x28   :  { %v44_v7 = vld [vmem:[#allocation2 + $0x18] sm:$0xff]  ;;  %v158_v8 = vmax.f32 %v41_v4, -128.0  ;;  %v161_v9 = vmax.f32 %v42_v5, -128.0  ;;  %v164_v10 = vmax.f32 %v43_v6, -128.0  ;;  %v66_v21 = vld [vmem:[#allocation5 + $0x10] sm:$0xff]  ;;  %s260_s7 = scalar_lea.vmem %s146_s6, 512  ;;  %p265_p3 = scmp.lt.s32.totalorder %s146_s6, %s146_s6 }
  0x29   :  { %183 = vmatprep.subr.bf16.mxu0 %v70_v1  ;;  %v167_v11 = vmax.f32 %v44_v7, -128.0  ;;  %v74_v23 = vunpack.c.l.s8.bf16 %v66_v21  ;;  %v75_v24 = vunpack.c.h.s8.bf16 %v66_v21  ;;  %v67_v25 = vld [vmem:[#allocation5 + $0x18] sm:$0xff]  ;;  %p261_p2 = scmp.ne.s32.totalorder %s146_s6, %s260_s7  ;;  %p266_p4 = scmp.lt.s32.totalorder %s260_s7, %s260_s7 }
  0x2a   :  { %184 = vmatpush3.bf16.msra.mxu0 %v70_v1  ;;  %v159_v13 = vmin.f32 %v158_v8, 127.0  ;;  %v162_v14 = vmin.f32 %v161_v9, 127.0  ;;  %v165_v15 = vmin.f32 %v164_v10, 127.0  ;;  %v76_v26 = vunpack.c.l.s8.bf16 %v67_v25 }
  0x2b   :  { %185 = vmatprep.subr.bf16.mxu0 %v71_v2  ;;  %v168_v16 = vmin.f32 %v167_v11, 127.0  ;;  %v77_v27 = vunpack.c.h.s8.bf16 %v67_v25  ;;  %p267_p5 = por %p266_p4, %p265_p3 }
  0x2c   :  { %v170_v17 = vpack.c.f32.eXmY %v159_v13, %v162_v14, 312 }
  0x2d   :  { %v171_v18 = vpack.c.f32.eXmY %v165_v15, %v168_v16, 312  ;;  %p268_p6 = pnand %p267_p5, %p261_p2 }
  0x2e   :  { %186 = vmatpush3.bf16.msra.mxu0 %v71_v2 }
  0x2f   :  { %187 = vmatprep.subr.bf16.mxu0 %v72_v12  ;;  %v172_v20 = vpack.c.b8 %v171_v18, %v170_v17 }
  0x31   :  { %v68_v22 = vunpack.c.l.s8.bf16 %v172_v20  ;;  %v69_v28 = vunpack.c.h.s8.bf16 %v172_v20 }
  0x32   :  { %188 = vmatpush3.bf16.msra.mxu0 %v72_v12 }
  0x33   :  { %189 = vmatprep.subr.bf16.mxu0 %v73_v19  ;;  %199 = vmatprep.mubr.bf16.mxu0 %v68_v22 }
  0x36   :  { %190 = vmatpush3.bf16.msra.mxu0 %v73_v19 }
  0x37   :  { %191 = vmatprep.subr.bf16.mxu0 %v74_v23 }
  0x3a   :  { %192 = vmatpush3.bf16.msra.mxu0 %v74_v23 }
  0x3b   :  { %193 = vmatprep.subr.bf16.mxu0 %v75_v24 }
  0x3e   :  { %194 = vmatpush3.bf16.msra.mxu0 %v75_v24 }
  0x3f   :  { %195 = vmatprep.subr.bf16.mxu0 %v76_v26 }
  0x42   :  { %196 = vmatpush3.bf16.msra.mxu0 %v76_v26 }
  0x43   :  { %197 = vmatprep.subr.bf16.mxu0 %v77_v27 }
  0x46   :  { %198 = vmatpush3.bf16.msra.mxu0 %v77_v27 }
  0x49   :  { %200 = vmatmul.mubr.bf16.vlgmr.msra.gmra.mrb[0].mxu0 %v69_v28 }
 0x11c   :  { %v201_v29 = vpop.f32.mrb[0].mxu0 }
 0x11d   :  { %v207_v30 = vtrunc.f32 %v201_v29  ;;  %v113_v31 = vpop.f32.mrb[1].mxu0 }
 0x11e   :  { %v203_v32 = vtrunc.f32 %v113_v31  ;;  %v202_v33 = vpop.f32.mrb[2].mxu0 }
 0x11f   :  { %v208_v34 = vcvt.f32.s32 %v207_v30  ;;  %v209_v35 = vtrunc.f32 %v202_v33  ;;  %v116_v36 = vpop.f32.mrb[3].mxu0 }
 0x120   :  { %v204_v37 = vcvt.f32.s32 %v203_v32  ;;  %v205_v38 = vtrunc.f32 %v116_v36 }
 0x121   :  { %v134_v39 = vcvt.s32.f32 %v208_v34  ;;  %v210_v40 = vcvt.f32.s32 %v209_v35 }
 0x122   :  { %v132_v41 = vcvt.s32.f32 %v204_v37  ;;  %v206_v42 = vcvt.f32.s32 %v205_v38 }
 0x123   :  { %138 = vst [vmem:[#allocation7 + $0x10] sm:$0xff] %v134_v39  ;;  %v135_v43 = vcvt.s32.f32 %v210_v40 }
 0x124   :  { %136 = vst [vmem:[#allocation7] sm:$0xff] %v132_v41  ;;  %v133_v44 = vcvt.s32.f32 %v206_v42 }
 0x125   :  { %139 = vst [vmem:[#allocation7 + $0x18] sm:$0xff] %v135_v43 }
 0x126   :  { %137 = vst [vmem:[#allocation7 + $0x8] sm:$0xff] %v133_v44 }
 0x127   :  { %271 = shalt.err (!%p268_p6)
}
 0x128   :  { %s272_s10 = scalar_lea.hbm %s355_s2, 512 }
 0x129   :  { %p273_p7 = scmp.ne.s32.totalorder %s355_s2, %s272_s10  ;;  %p276_p8 = scmp.lt.u32.totalorder %s272_s10, %s355_s2 }
 0x12b   :  { %p278_p9 = pnand %p276_p8, %p273_p7 }
 0x12d   :  { %281 = shalt.err (!%p278_p9)
}
 0x12e   :  { %151 = dma.vmem_to_hbm [thread:$0]  %s146_s6, 512, %s355_s2, [#allocation4], %s289_s19, %s289_s19, %s290_s20  }
 0x12f   :  { %286 = dma.done.wait [#allocation4], 512  }
 0x130   :  { %287 = vsyncadd [#allocation4], 4294966784 }
 0x131   :  { %155 = vsyncpa [#allocation3], 1 }
 0x132   :  { %156 = vsyncpa [#allocation6], 1 }
 0x133   :  { %157 = vsyncpa [#allocation4], 1 }

// kernel: tpu_custom_call.1
= control target key start
LH: loop header
LB: loop body
LE: loop exit
PB: predicated region body
PF: predicated region fallthrough
CT: control target
= control target key end

     0   :  { %7 = vsyncpa [#allocation3], 0  ;;  %s300_s0 = inlined_call_operand.hbm [shape: bf16[16,128], index: 0, kind: input, shape index: {}]   ;;  %s301_s1 = inlined_call_operand.hbm [shape: s8[128,128], index: 1, kind: input, shape index: {}]   ;;  %s302_s2 = inlined_call_operand.hbm [shape: f32[16,128], index: 2, kind: output, shape index: {}]  }
   0x1   :  { %8 = vsyncpa [#allocation6], 0 }
   0x2   :  { %9 = vsyncpa [#allocation4], 0  ;;  %s234_s9 = smov [#allocation2]   ;;  %s162_s13 = scalar_lea.hbm %s300_s0, 128 }
   0x3   :  { %s15_s10 = sshll.u32 %s234_s9, 4  ;;  %p163_p0 = scmp.ne.s32.totalorder %s300_s0, %s162_s13  ;;  %s16_s10 = int_to_ptr.vmem [resolvable:$true] %s15_s10 }
   0x4   :  { %p166_p1 = scmp.lt.u32.totalorder %s162_s13, %s300_s0 }
   0x6   :  { %p168_p2 = pnand %p166_p1, %p163_p0 }
   0x8   :  { %171 = shalt.err (!%p168_p2)
}
   0x9   :  { %s172_s18 = scalar_lea.vmem %s16_s10, 128  ;;  %p177_p4 = scmp.lt.s32.totalorder %s16_s10, %s16_s10 }
   0xa   :  { %p173_p3 = scmp.ne.s32.totalorder %s16_s10, %s172_s18  ;;  %p178_p5 = scmp.lt.s32.totalorder %s172_s18, %s172_s18 }
   0xc   :  { %p179_p6 = por %p178_p5, %p177_p4 }
   0xe   :  { %p180_p7 = pnand %p179_p6, %p173_p3 }
  0x10   :  { %183 = shalt.err (!%p180_p7)
}
  0x11   :  { %s235_s19 = smov 64   ;;  %s236_s20 = smov 4  }
  0x12   :  { %21 = dma.hbm_to_vmem [thread:$0]  %s300_s0, 128, %s16_s10, [#allocation3], %s235_s19, %s235_s19, %s236_s20  }
  0x13   :  { %s237_s23 = smov [#allocation5]   ;;  %s184_s27 = scalar_lea.hbm %s301_s1, 512 }
  0x14   :  { %s27_s24 = sshll.u32 %s237_s23, 4  ;;  %p185_p8 = scmp.ne.s32.totalorder %s301_s1, %s184_s27  ;;  %s28_s24 = int_to_ptr.vmem [resolvable:$true] %s27_s24 }
  0x15   :  { %p188_p9 = scmp.lt.u32.totalorder %s184_s27, %s301_s1 }
  0x17   :  { %p190_p10 = pnand %p188_p9, %p185_p8 }
  0x19   :  { %193 = shalt.err (!%p190_p10)
}
  0x1a   :  { %s194_s4 = scalar_lea.vmem %s28_s24, 512  ;;  %p199_p12 = scmp.lt.s32.totalorder %s28_s24, %s28_s24 }
  0x1b   :  { %p195_p11 = scmp.ne.s32.totalorder %s28_s24, %s194_s4  ;;  %p200_p13 = scmp.lt.s32.totalorder %s194_s4, %s194_s4 }
  0x1d   :  { %p201_p0 = por %p200_p13, %p199_p12 }
  0x1f   :  { %p202_p1 = pnand %p201_p0, %p195_p11 }
  0x21   :  { %205 = shalt.err (!%p202_p1)
}
  0x22   :  { %s238_s0 = smov 128   ;;  %s239_s5 = smov 8  }
  0x23   :  { %33 = dma.hbm_to_vmem [thread:$0]  %s301_s1, 512, %s28_s24, [#allocation6], %s238_s0, %s238_s0, %s239_s5  }
  0x24   :  { %228 = dma.done.wait [#allocation3], 128  }
  0x25   :  { %229 = vsyncadd [#allocation3], 4294967168 }
  0x26   :  { %230 = dma.done.wait [#allocation6], 512  }
  0x27   :  { %231 = vsyncadd [#allocation6], 4294966784  ;;  %v240_v0 = vmov 0.0   ;;  %vm241_vm0 = vmmov 0   ;;  %v43_v1 = vld [vmem:[#allocation5] sm:$0xff]  ;;  %v44_v4 = vld [vmem:[#allocation5 + $0x8] sm:$0xff] }
  0x28   :  { %132 = vmatprep.subr.bf16.mxu0 %v240_v0  ;;  %148 = vmatprep.mubr.msk.bf16.mxu0 %vm241_vm0, %v240_v0  ;;  %v47_v2 = vunpack.c.l.s8.bf16 %v43_v1  ;;  %v48_v3 = vunpack.c.h.s8.bf16 %v43_v1  ;;  %v49_v5 = vunpack.c.l.s8.bf16 %v44_v4  ;;  %v50_v6 = vunpack.c.h.s8.bf16 %v44_v4  ;;  %v45_v7 = vld [vmem:[#allocation5 + $0x10] sm:$0xff]  ;;  %v46_v10 = vld [vmem:[#allocation5 + $0x18] sm:$0xff]  ;;  %s242_s1 = smov [#allocation7]  }
  0x29   :  { %v51_v8 = vunpack.c.l.s8.bf16 %v45_v7  ;;  %v52_v9 = vunpack.c.h.s8.bf16 %v45_v7  ;;  %v53_v11 = vunpack.c.l.s8.bf16 %v46_v10  ;;  %v54_v12 = vunpack.c.h.s8.bf16 %v46_v10  ;;  %v161_v13 = vld [vmem:[#allocation2] sm:$0xff]   ;;  %s109_s8 = sshll.u32 %s242_s1, 4  ;;  %s110_s8 = int_to_ptr.vmem [resolvable:$true] %s109_s8 }
  0x2a   :  { %133 = vmatpush3.bf16.msra.mxu0 %v47_v2  ;;  %s206_s9 = scalar_lea.vmem %s110_s8, 256  ;;  %p211_p3 = scmp.lt.s32.totalorder %s110_s8, %s110_s8 }
  0x2b   :  { %134 = vmatprep.subr.bf16.mxu0 %v240_v0  ;;  %p207_p2 = scmp.ne.s32.totalorder %s110_s8, %s206_s9  ;;  %p212_p4 = scmp.lt.s32.totalorder %s206_s9, %s206_s9 }
  0x2d   :  { %p213_p5 = por %p212_p4, %p211_p3 }
  0x2e   :  { %135 = vmatpush3.bf16.msra.mxu0 %v48_v3 }
  0x2f   :  { %136 = vmatprep.subr.bf16.mxu0 %v240_v0  ;;  %p214_p6 = pnand %p213_p5, %p207_p2 }
  0x32   :  { %137 = vmatpush3.bf16.msra.mxu0 %v49_v5 }
  0x33   :  { %138 = vmatprep.subr.bf16.mxu0 %v240_v0 }
  0x36   :  { %139 = vmatpush3.bf16.msra.mxu0 %v50_v6 }
  0x37   :  { %140 = vmatprep.subr.bf16.mxu0 %v240_v0 }
  0x3a   :  { %141 = vmatpush3.bf16.msra.mxu0 %v51_v8 }
  0x3b   :  { %142 = vmatprep.subr.bf16.mxu0 %v240_v0 }
  0x3e   :  { %143 = vmatpush3.bf16.msra.mxu0 %v52_v9 }
  0x3f   :  { %144 = vmatprep.subr.bf16.mxu0 %v240_v0 }
  0x42   :  { %145 = vmatpush3.bf16.msra.mxu0 %v53_v11 }
  0x43   :  { %146 = vmatprep.subr.bf16.mxu0 %v240_v0 }
  0x46   :  { %147 = vmatpush3.bf16.msra.mxu0 %v54_v12 }
  0x49   :  { %149 = vmatmul.mubr.bf16.vlgmr.msra.gmra.mrb[0].mxu0 %v161_v13 }
 0x11c   :  { %v95_v14 = vpop.f32.mrb[0].mxu0 }
 0x11d   :  { %102 = vst [vmem:[#allocation7] sm:$0xff] %v95_v14  ;;  %v150_v15 = vpop.f32.mrb[1].mxu0 }
 0x11e   :  { %v98_v16 = vpop.f32.mrb[2].mxu0 }
 0x11f   :  { %103 = vst [vmem:[#allocation7 + $0x8] sm:$0xff] %v98_v16  ;;  %v151_v17 = vpop.f32.mrb[3].mxu0 }
 0x120   :  { %217 = shalt.err (!%p214_p6)
}
 0x121   :  { %s218_s12 = scalar_lea.hbm %s302_s2, 256 }
 0x122   :  { %p219_p7 = scmp.ne.s32.totalorder %s302_s2, %s218_s12  ;;  %p222_p8 = scmp.lt.u32.totalorder %s218_s12, %s302_s2 }
 0x124   :  { %p224_p9 = pnand %p222_p8, %p219_p7 }
 0x126   :  { %227 = shalt.err (!%p224_p9)
}
 0x127   :  { %115 = dma.vmem_to_hbm [thread:$0]  %s110_s8, 256, %s302_s2, [#allocation4], %s238_s0, %s238_s0, %s239_s5  }
 0x128   :  { %232 = dma.done.wait [#allocation4], 256  }
 0x129   :  { %233 = vsyncadd [#allocation4], 4294967040 }
 0x12a   :  { %119 = vsyncpa [#allocation3], 1 }
 0x12b   :  { %120 = vsyncpa [#allocation6], 1 }
 0x12c   :  { %121 = vsyncpa [#allocation4], 1 }

// kernel: tpu_custom_call.1
= control target key start
LH: loop header
LB: loop body
LE: loop exit
PB: predicated region body
PF: predicated region fallthrough
CT: control target
= control target key end

     0   :  { %10 = vsyncpa [#allocation6], 0  ;;  %s774_s0 = inlined_call_operand.<no memory space> [shape: f32[1,1], index: 0, kind: input, shape index: {}]   ;;  %s775_s1 = inlined_call_operand.hbm [shape: f32[32,256], index: 1, kind: input, shape index: {}]   ;;  %s776_s2 = inlined_call_operand.hbm [shape: bf16[256,256], index: 2, kind: input, shape index: {}]   ;;  %s777_s3 = inlined_call_operand.vmem [shape: f32[1,256], index: 3, kind: input, shape index: {}]   ;;  %s778_s4 = inlined_call_operand.hbm [shape: f32[32,256], index: 4, kind: output, shape index: {}]  }
   0x1   :  { %11 = vsyncpa [#allocation9], 0 }
   0x2   :  { %12 = vsyncpa [#allocation7], 0  ;;  %s661_s15 = smov [#allocation5]   ;;  %s589_s19 = scalar_lea.hbm %s775_s1, 1024 }
   0x3   :  { %s20_s16 = sshll.u32 %s661_s15, 4  ;;  %p590_p0 = scmp.ne.s32.totalorder %s775_s1, %s589_s19  ;;  %s21_s16 = int_to_ptr.vmem [resolvable:$true] %s20_s16 }
   0x4   :  { %p593_p1 = scmp.lt.u32.totalorder %s589_s19, %s775_s1 }
   0x6   :  { %p595_p2 = pnand %p593_p1, %p590_p0 }
   0x8   :  { %598 = shalt.err (!%p595_p2)
}
   0x9   :  { %s599_s24 = scalar_lea.vmem %s21_s16, 1024  ;;  %p604_p4 = scmp.lt.s32.totalorder %s21_s16, %s21_s16 }
   0xa   :  { %p600_p3 = scmp.ne.s32.totalorder %s21_s16, %s599_s24  ;;  %p605_p5 = scmp.lt.s32.totalorder %s599_s24, %s599_s24 }
   0xc   :  { %p606_p6 = por %p605_p5, %p604_p4 }
   0xe   :  { %p607_p7 = pnand %p606_p6, %p600_p3 }
  0x10   :  { %610 = shalt.err (!%p607_p7)
}
  0x11   :  { %s662_s25 = smov 256   ;;  %s663_s26 = smov 16  }
  0x12   :  { %26 = dma.hbm_to_vmem [thread:$0]  %s775_s1, 1024, %s21_s16, [#allocation6], %s662_s25, %s662_s25, %s663_s26  }
  0x13   :  { %s664_s29 = smov [#allocation8]   ;;  %s611_s7 = scalar_lea.hbm %s776_s2, 4096 }
  0x14   :  { %s32_s30 = sshll.u32 %s664_s29, 4  ;;  %p612_p8 = scmp.ne.s32.totalorder %s776_s2, %s611_s7  ;;  %s33_s30 = int_to_ptr.vmem [resolvable:$true] %s32_s30 }
  0x15   :  { %p615_p9 = scmp.lt.u32.totalorder %s611_s7, %s776_s2 }
  0x17   :  { %p617_p10 = pnand %p615_p9, %p612_p8 }
  0x19   :  { %620 = shalt.err (!%p617_p10)
}
  0x1a   :  { %s621_s12 = scalar_lea.vmem %s33_s30, 4096  ;;  %p626_p12 = scmp.lt.s32.totalorder %s33_s30, %s33_s30 }
  0x1b   :  { %p622_p11 = scmp.ne.s32.totalorder %s33_s30, %s621_s12  ;;  %p627_p13 = scmp.lt.s32.totalorder %s621_s12, %s621_s12 }
  0x1d   :  { %p628_p0 = por %p627_p13, %p626_p12 }
  0x1f   :  { %p629_p1 = pnand %p628_p0, %p622_p11 }
  0x21   :  { %632 = shalt.err (!%p629_p1)
}
  0x22   :  { %s665_s1 = smov 128   ;;  %s666_s13 = smov 8  }
  0x23   :  { %38 = dma.hbm_to_vmem [thread:$0]  %s776_s2, 4096, %s33_s30, [#allocation9], %s665_s1, %s665_s1, %s666_s13  }
  0x24   :  { %655 = dma.done.wait [#allocation6], 1024  }
  0x25   :  { %656 = vsyncadd [#allocation6], 4294966272 }
  0x26   :  { %657 = dma.done.wait [#allocation9], 4096  }
  0x27   :  { %658 = vsyncadd [#allocation9], 4294963200  ;;  %v721_v0 = vld [vmem:[#allocation5 + $0x20] sm:$0xff]  ;;  %v723_v1 = vld [vmem:[#allocation5 + $0x28] sm:$0xff]  ;;  %v667_v43 = vmov 0   ;;  %vm89_vm0 = vcmask 0  }
  0x28   :  { %v725_v2 = vld [vmem:[#allocation5] sm:$0xff]  ;;  %v63_v3 = vand.u32 2147483647, %v721_v0  ;;  %v64_v4 = vand.u32 2147483647, %v723_v1  ;;  %v729_v5 = vld [vmem:[#allocation5 + $0x8] sm:$0xff]  ;;  %538 = vset.pattern.permute.xlu0 %v667_v43 }
  0x29   :  { %v59_v6 = vand.u32 2147483647, %v725_v2  ;;  %v732_v7 = vld [vmem:[#allocation5 + $0x30] sm:$0xff]  ;;  %v734_v8 = vld [vmem:[#allocation5 + $0x38] sm:$0xff]  ;;  %v60_v10 = vand.u32 2147483647, %v729_v5 }
  0x2a   :  { %v73_v9 = vmax.f32.f32 %v63_v3, %v64_v4  ;;  %v65_v11 = vand.u32 2147483647, %v732_v7  ;;  %v738_v12 = vld [vmem:[#allocation5 + $0x10] sm:$0xff]  ;;  %v66_v13 = vand.u32 2147483647, %v734_v8  ;;  %v741_v14 = vld [vmem:[#allocation5 + $0x18] sm:$0xff] }
  0x2b   :  { %v61_v15 = vand.u32 2147483647, %v738_v12  ;;  %v67_v16 = vmax.f32.f32 %v59_v6, %v60_v10  ;;  %v62_v17 = vand.u32 2147483647, %v741_v14  ;;  %v539_v19 = vld [vmem:[#allocation8 + $0x4] ss:$8 sps:$4 sm:$0xff]  }
  0x2c   :  { %74 = vmax.xlane.f32.xlu1 %v73_v9  ;;  %v76_v18 = vmax.f32.f32 %v65_v11, %v66_v13  ;;  %v541_v20 = vld [vmem:[#allocation8] ss:$8 sps:$4 sm:$0xff]   ;;  %v542_v22 = vld [vmem:[#allocation8 + $0x14] ss:$8 sps:$4 sm:$0xff]   ;;  %336 = vmatprep.subr.bf16.mxu0 %v539_v19  ;;  %v544_v23 = vld [vmem:[#allocation8 + $0x10] ss:$8 sps:$4 sm:$0xff]   ;;  %v396_v9 = vlaneseq  ;;  %v391_v11 = vstv %s774_s0 }
  0x2d   :  { %68 = vmax.xlane.f32.xlu0 %v67_v16  ;;  %v70_v21 = vmax.f32.f32 %v61_v15, %v62_v17  ;;  %490 = vmatprep.subr.bf16.mxu1 %v539_v19  ;;  %v545_v24 = vld [vmem:[#allocation8 + $0x24] ss:$8 sps:$4 sm:$0xff]   ;;  %v547_v25 = vld [vmem:[#allocation8 + $0x20] ss:$8 sps:$4 sm:$0xff]   ;;  %v548_v26 = vld [vmem:[#allocation8 + $0x34] ss:$8 sps:$4 sm:$0xff]  }
  0x2e   :  { %337 = vmatpush1.bf16.msra.mxu0 %v541_v20  ;;  %506 = vmatpush1.bf16.msra.mxu1 %v541_v20  ;;  %v550_v27 = vld [vmem:[#allocation8 + $0x30] ss:$8 sps:$4 sm:$0xff]   ;;  %v551_v28 = vld [vmem:[#allocation8 + $0x44] ss:$8 sps:$4 sm:$0xff]   ;;  %v553_v29 = vld [vmem:[#allocation8 + $0x40] ss:$8 sps:$4 sm:$0xff]  }
  0x2f   :  { %338 = vmatprep.subr.bf16.mxu0 %v542_v22  ;;  %491 = vmatprep.subr.bf16.mxu1 %v542_v22  ;;  %v554_v30 = vld [vmem:[#allocation8 + $0x54] ss:$8 sps:$4 sm:$0xff]   ;;  %v556_v31 = vld [vmem:[#allocation8 + $0x50] ss:$8 sps:$4 sm:$0xff]   ;;  %v557_v32 = vld [vmem:[#allocation8 + $0x64] ss:$8 sps:$4 sm:$0xff]  }
  0x30   :  { %77 = vmax.xlane.f32.xlu1 %v76_v18  ;;  %v559_v33 = vld [vmem:[#allocation8 + $0x60] ss:$8 sps:$4 sm:$0xff]   ;;  %v560_v34 = vld [vmem:[#allocation8 + $0x74] ss:$8 sps:$4 sm:$0xff]   ;;  %v562_v35 = vld [vmem:[#allocation8 + $0x70] ss:$8 sps:$4 sm:$0xff]  }
  0x31   :  { %71 = vmax.xlane.f32.xlu0 %v70_v21  ;;  %v563_v36 = vld [vmem:[#allocation8 + $0x84] ss:$8 sps:$4 sm:$0xff]   ;;  %v565_v37 = vld [vmem:[#allocation8 + $0x80] ss:$8 sps:$4 sm:$0xff]   ;;  %v566_v38 = vld [vmem:[#allocation8 + $0x94] ss:$8 sps:$4 sm:$0xff]  }
  0x32   :  { %339 = vmatpush1.bf16.msra.mxu0 %v544_v23  ;;  %507 = vmatpush1.bf16.msra.mxu1 %v544_v23  ;;  %v568_v39 = vld [vmem:[#allocation8 + $0x90] ss:$8 sps:$4 sm:$0xff]   ;;  %v569_v40 = vld [vmem:[#allocation8 + $0xa4] ss:$8 sps:$4 sm:$0xff]   ;;  %v571_v41 = vld [vmem:[#allocation8 + $0xa0] ss:$8 sps:$4 sm:$0xff]  }
  0x33   :  { %340 = vmatprep.subr.bf16.mxu0 %v545_v24  ;;  %492 = vmatprep.subr.bf16.mxu1 %v545_v24  ;;  %v572_v42 = vld [vmem:[#allocation8 + $0xb4] ss:$8 sps:$4 sm:$0xff]   ;;  %v574_v44 = vld [vmem:[#allocation8 + $0xb0] ss:$8 sps:$4 sm:$0xff]   ;;  %v575_v45 = vld [vmem:[#allocation8 + $0xc4] ss:$8 sps:$4 sm:$0xff]  }
  0x34   :  { %v577_v46 = vld [vmem:[#allocation8 + $0xc0] ss:$8 sps:$4 sm:$0xff]   ;;  %v578_v47 = vld [vmem:[#allocation8 + $0xd4] ss:$8 sps:$4 sm:$0xff]   ;;  %v580_v48 = vld [vmem:[#allocation8 + $0xd0] ss:$8 sps:$4 sm:$0xff]  }
  0x35   :  { %v581_v49 = vld [vmem:[#allocation8 + $0xe4] ss:$8 sps:$4 sm:$0xff]   ;;  %v583_v50 = vld [vmem:[#allocation8 + $0xe0] ss:$8 sps:$4 sm:$0xff]   ;;  %v584_v51 = vld [vmem:[#allocation8 + $0xf4] ss:$8 sps:$4 sm:$0xff]  }
  0x36   :  { %341 = vmatpush1.bf16.msra.mxu0 %v547_v25  ;;  %508 = vmatpush1.bf16.msra.mxu1 %v547_v25  ;;  %v586_v52 = vld [vmem:[#allocation8 + $0xf0] ss:$8 sps:$4 sm:$0xff]   ;;  %v397_v10 = vshrl.u32 %v396_v9, 7  ;;  %v95_v13 = vmul.f32 128.0, %v721_v0  ;;  %v96_v15 = vmul.f32 128.0, %v723_v1  ;;  %v92_v16 = vmul.f32 128.0, %v729_v5 }
  0x37   :  { %342 = vmatprep.subr.bf16.mxu0 %v548_v26  ;;  %493 = vmatprep.subr.bf16.mxu1 %v548_v26  ;;  %v94_v18 = vmul.f32 128.0, %v741_v14  ;;  %v98_v19 = vmul.f32 128.0, %v734_v8  ;;  %v91_v20 = vmul.f32 128.0, %v725_v2  ;;  %v93_v21 = vmul.f32 128.0, %v738_v12 }
  0x38   :  { %v398_v23 = vsub.s32 0, %v397_v10  ;;  %v97_v25 = vmul.f32 128.0, %v732_v7 }
  0x3a   :  { %343 = vmatpush1.bf16.msra.mxu0 %v550_v27  ;;  %509 = vmatpush1.bf16.msra.mxu1 %v550_v27 }
  0x3b   :  { %344 = vmatprep.subr.bf16.mxu0 %v551_v28  ;;  %494 = vmatprep.subr.bf16.mxu1 %v551_v28 }
  0x3e   :  { %345 = vmatpush1.bf16.msra.mxu0 %v553_v29  ;;  %510 = vmatpush1.bf16.msra.mxu1 %v553_v29 }
  0x3f   :  { %346 = vmatprep.subr.bf16.mxu0 %v554_v30  ;;  %495 = vmatprep.subr.bf16.mxu1 %v554_v30 }
  0x42   :  { %347 = vmatpush1.bf16.msra.mxu0 %v556_v31  ;;  %511 = vmatpush1.bf16.msra.mxu1 %v556_v31 }
  0x43   :  { %348 = vmatprep.subr.bf16.mxu0 %v557_v32  ;;  %496 = vmatprep.subr.bf16.mxu1 %v557_v32 }
  0x46   :  { %349 = vmatpush1.bf16.msra.mxu0 %v559_v33  ;;  %512 = vmatpush1.bf16.msra.mxu1 %v559_v33 }
  0x47   :  { %350 = vmatprep.subr.bf16.mxu0 %v560_v34  ;;  %497 = vmatprep.subr.bf16.mxu1 %v560_v34 }
  0x4a   :  { %351 = vmatpush1.bf16.msra.mxu0 %v562_v35  ;;  %513 = vmatpush1.bf16.msra.mxu1 %v562_v35 }
  0x4b   :  { %352 = vmatprep.subr.bf16.mxu0 %v563_v36  ;;  %498 = vmatprep.subr.bf16.mxu1 %v563_v36 }
  0x4e   :  { %353 = vmatpush1.bf16.msra.mxu0 %v565_v37  ;;  %514 = vmatpush1.bf16.msra.mxu1 %v565_v37 }
  0x4f   :  { %354 = vmatprep.subr.bf16.mxu0 %v566_v38  ;;  %499 = vmatprep.subr.bf16.mxu1 %v566_v38 }
  0x52   :  { %355 = vmatpush1.bf16.msra.mxu0 %v568_v39  ;;  %515 = vmatpush1.bf16.msra.mxu1 %v568_v39 }
  0x53   :  { %356 = vmatprep.subr.bf16.mxu0 %v569_v40  ;;  %500 = vmatprep.subr.bf16.mxu1 %v569_v40 }
  0x56   :  { %357 = vmatpush1.bf16.msra.mxu0 %v571_v41  ;;  %516 = vmatpush1.bf16.msra.mxu1 %v571_v41 }
  0x57   :  { %358 = vmatprep.subr.bf16.mxu0 %v572_v42  ;;  %501 = vmatprep.subr.bf16.mxu1 %v572_v42 }
  0x5a   :  { %359 = vmatpush1.bf16.msra.mxu0 %v574_v44  ;;  %517 = vmatpush1.bf16.msra.mxu1 %v574_v44 }
  0x5b   :  { %360 = vmatprep.subr.bf16.mxu0 %v575_v45  ;;  %502 = vmatprep.subr.bf16.mxu1 %v575_v45 }
  0x5e   :  { %361 = vmatpush1.bf16.msra.mxu0 %v577_v46  ;;  %518 = vmatpush1.bf16.msra.mxu1 %v577_v46 }
  0x5f   :  { %362 = vmatprep.subr.bf16.mxu0 %v578_v47  ;;  %503 = vmatprep.subr.bf16.mxu1 %v578_v47 }
  0x62   :  { %363 = vmatpush1.bf16.msra.mxu0 %v580_v48  ;;  %519 = vmatpush1.bf16.msra.mxu1 %v580_v48 }
  0x63   :  { %364 = vmatprep.subr.bf16.mxu0 %v581_v49  ;;  %504 = vmatprep.subr.bf16.mxu1 %v581_v49 }
  0x66   :  { %365 = vmatpush1.bf16.msra.mxu0 %v583_v50  ;;  %520 = vmatpush1.bf16.msra.mxu1 %v583_v50 }
  0x67   :  { %366 = vmatprep.subr.bf16.mxu0 %v584_v51  ;;  %505 = vmatprep.subr.bf16.mxu1 %v584_v51 }
  0x6a   :  { %367 = vmatpush1.bf16.msra.mxu0 %v586_v52  ;;  %521 = vmatpush1.bf16.msra.mxu1 %v586_v52 }
  0xb9   :  { %v75_v53 = vpop.xlane.xlu1 %74 }
  0xba   :  { %v69_v54 = vpop.xlane.xlu0 %68 }
  0xbd   :  { %v78_v55 = vpop.xlane.xlu1 %77 }
  0xbe   :  { %v80_v56 = vmax.f32 %v75_v53, %v78_v55  ;;  %v72_v57 = vpop.xlane.xlu0 %71 }
  0xbf   :  { %v79_v58 = vmax.f32 %v69_v54, %v72_v57  ;;  %v420_v57 = vsub.s32 1, %v397_v10 }
  0xc1   :  { %v81_v59 = vmax.f32 %v79_v58, %v80_v56  ;;  %v412_v56 = vld [vmem:[%s777_s3] sm:$0x3]  ;;  %s668_s3 = smov [#allocation10]  }
  0xc2   :  { %v417_v58 = vrot.slane %v412_v56, %v398_v23  ;;  %s445_s18 = sshll.u32 %s668_s3, 4  ;;  %s446_s18 = int_to_ptr.vmem [resolvable:$true] %s445_s18 }
  0xc3   :  { %v82_v60 = vrot.slane %v81_v59, 4  ;;  %s633_s19 = scalar_lea.vmem %s446_s18, 1024  ;;  %p638_p3 = scmp.lt.s32.totalorder %s446_s18, %s446_s18 }
  0xc4   :  { %p634_p2 = scmp.ne.s32.totalorder %s446_s18, %s633_s19  ;;  %p639_p4 = scmp.lt.s32.totalorder %s633_s19, %s633_s19 }
  0xc5   :  { %v83_v61 = vmax.f32 %v81_v59, %v82_v60  ;;  %v421_v59 = vrot.slane %v412_v56, %v420_v57 }
  0xc6   :  { %p640_p5 = por %p639_p4, %p638_p3 }
  0xc7   :  { %v84_v62 = vrot.slane %v83_v61, 2 }
  0xc8   :  { %p641_p6 = pnand %p640_p5, %p634_p2 }
  0xc9   :  { %v85_v63 = vmax.f32 %v83_v61, %v84_v62 }
  0xcb   :  { %v86_v3 = vrot.slane %v85_v63, 1 }
  0xcd   :  { %v87_v4 = vmax.f32 %v85_v63, %v86_v3 }
  0xcf   :  { %v88_v6 = vmax.f32 %v87_v4, 1e-05 }
  0xd1   :  { %90 = vst.msk [vmem:[#allocation3] sm:$0x1] %vm89_vm0, %v88_v6  ;;  %587 = vrcp.f32 %v88_v6 }
  0xd8   :  { %v390_v17 = vld [vmem:[#allocation3] sm:$0x1] }
  0xd9   :  { %v392_v22 = vmul.f32 %v391_v11, %v390_v17 }
  0xdb   :  { %v588_v24 = vpop.eup %587  ;;  %v394_v26 = vmul.f32 0.0078125, %v392_v22 }
  0xdc   :  { %v101_v0 = vmul.f32 %v588_v24, %v92_v16  ;;  %v103_v27 = vmul.f32 %v588_v24, %v94_v18  ;;  %v105_v1 = vmul.f32 %v588_v24, %v96_v15  ;;  %v107_v28 = vmul.f32 %v588_v24, %v98_v19 }
  0xdd   :  { %v399_v5 = vrot.slane %v394_v26, %v398_v23  ;;  %v100_v29 = vmul.f32 %v588_v24, %v91_v20  ;;  %v102_v30 = vmul.f32 %v588_v24, %v93_v21  ;;  %v104_v14 = vmul.f32 %v588_v24, %v95_v13 }
  0xde   :  { %v523_v31 = vround.rtne.f32 %v101_v0  ;;  %v525_v8 = vround.rtne.f32 %v103_v27  ;;  %v527_v32 = vround.rtne.f32 %v105_v1  ;;  %v529_v2 = vround.rtne.f32 %v107_v28 }
  0xdf   :  { %401 = vperm.xlu0 %538, %v399_v5   ;;  %v522_v12 = vround.rtne.f32 %v100_v29  ;;  %v524_v33 = vround.rtne.f32 %v102_v30  ;;  %v106_v34 = vmul.f32 %v588_v24, %v97_v25  ;;  %v526_v35 = vround.rtne.f32 %v104_v14 }
  0xe0   :  { %v117_v36 = vmax.f32 %v523_v31, -128.0  ;;  %v119_v7 = vmax.f32 %v525_v8, -128.0  ;;  %v121_v37 = vmax.f32 %v527_v32, -128.0  ;;  %v123_v38 = vmax.f32 %v529_v2, -128.0 }
  0xe1   :  { %v116_v39 = vmax.f32 %v522_v12, -128.0  ;;  %v118_v40 = vmax.f32 %v524_v33, -128.0  ;;  %v528_v41 = vround.rtne.f32 %v106_v34  ;;  %v120_v42 = vmax.f32 %v526_v35, -128.0 }
  0xe2   :  { %v125_v43 = vmin.f32 %v117_v36, 127.0  ;;  %v127_v44 = vmin.f32 %v119_v7, 127.0  ;;  %v129_v45 = vmin.f32 %v121_v37, 127.0  ;;  %v131_v46 = vmin.f32 %v123_v38, 127.0 }
  0xe3   :  { %v124_v47 = vmin.f32 %v116_v39, 127.0  ;;  %v126_v48 = vmin.f32 %v118_v40, 127.0  ;;  %v122_v49 = vmax.f32 %v528_v41, -128.0  ;;  %v128_v50 = vmin.f32 %v120_v42, 127.0 }
  0xe4   :  { %v133_v51 = vpack.c.bf16 %v127_v44, %v125_v43  ;;  %v135_v52 = vpack.c.bf16 %v131_v46, %v129_v45 }
  0xe5   :  { %v132_v53 = vpack.c.bf16 %v126_v48, %v124_v47  ;;  %v130_v54 = vmin.f32 %v122_v49, 127.0 }
  0xe6   :  { %368 = vmatprep.mubr.bf16.mxu0 %v133_v51  ;;  %378 = vmatprep.mubr.bf16.mxu1 %v135_v52 }
  0xe7   :  { %369 = vmatmul.mubr.bf16.vlgmr.msra.gmra.mrb[0].mxu0 %v132_v53  ;;  %v134_v55 = vpack.c.bf16 %v130_v54, %v128_v50 }
  0xe9   :  { %379 = vmatmul.mubr.bf16.vlgmr.msra.gmra.mrb[0].mxu1 %v134_v55 }
 0x15e   :  { %v402_v60 = vpop.permute.xlu0 %401 }
 0x1ba   :  { %v370_v61 = vpop.f32.mrb[0].mxu0 }
 0x1bb   :  { %v404_v62 = vmul.f32 %v402_v60, %v370_v61  ;;  %v372_v63 = vpop.f32.mrb[1].mxu0 }
 0x1bc   :  { %v380_v3 = vpop.f32.mrb[0].mxu1  ;;  %v405_v4 = vmul.f32 %v402_v60, %v372_v63  ;;  %v374_v6 = vpop.f32.mrb[2].mxu0 }
 0x1bd   :  { %v424_v9 = vadd.f32 %v417_v58, %v404_v62  ;;  %v408_v11 = vmul.f32 %v402_v60, %v380_v3  ;;  %v382_v13 = vpop.f32.mrb[1].mxu1  ;;  %v406_v15 = vmul.f32 %v402_v60, %v374_v6  ;;  %v376_v16 = vpop.f32.mrb[3].mxu0 }
 0x1be   :  { %v425_v17 = vadd.f32 %v421_v59, %v405_v4  ;;  %v409_v18 = vmul.f32 %v402_v60, %v382_v13  ;;  %v384_v19 = vpop.f32.mrb[2].mxu1  ;;  %v407_v20 = vmul.f32 %v402_v60, %v376_v16 }
 0x1bf   :  { %432 = vst [vmem:[#allocation10] sm:$0xff] %v424_v9  ;;  %v428_v10 = vadd.f32 %v417_v58, %v408_v11  ;;  %v426_v21 = vadd.f32 %v417_v58, %v406_v15  ;;  %v410_v22 = vmul.f32 %v402_v60, %v384_v19  ;;  %v386_v23 = vpop.f32.mrb[3].mxu1 }
 0x1c0   :  { %433 = vst [vmem:[#allocation10 + $0x8] sm:$0xff] %v425_v17  ;;  %v429_v24 = vadd.f32 %v421_v59, %v409_v18  ;;  %v427_v25 = vadd.f32 %v421_v59, %v407_v20  ;;  %v411_v26 = vmul.f32 %v402_v60, %v386_v23 }
 0x1c1   :  { %436 = vst [vmem:[#allocation10 + $0x20] sm:$0xff] %v428_v10  ;;  %434 = vst [vmem:[#allocation10 + $0x10] sm:$0xff] %v426_v21  ;;  %v430_v0 = vadd.f32 %v417_v58, %v410_v22 }
 0x1c2   :  { %437 = vst [vmem:[#allocation10 + $0x28] sm:$0xff] %v429_v24  ;;  %435 = vst [vmem:[#allocation10 + $0x18] sm:$0xff] %v427_v25  ;;  %v431_v27 = vadd.f32 %v421_v59, %v411_v26 }
 0x1c3   :  { %438 = vst [vmem:[#allocation10 + $0x30] sm:$0xff] %v430_v0 }
 0x1c4   :  { %439 = vst [vmem:[#allocation10 + $0x38] sm:$0xff] %v431_v27 }
 0x1c5   :  { %644 = shalt.err (!%p641_p6)
}
 0x1c6   :  { %s645_s22 = scalar_lea.hbm %s778_s4, 1024 }
 0x1c7   :  { %p646_p7 = scmp.ne.s32.totalorder %s778_s4, %s645_s22  ;;  %p649_p8 = scmp.lt.u32.totalorder %s645_s22, %s778_s4 }
 0x1c9   :  { %p651_p9 = pnand %p649_p8, %p646_p7 }
 0x1cb   :  { %654 = shalt.err (!%p651_p9)
}
 0x1cc   :  { %451 = dma.vmem_to_hbm [thread:$0]  %s446_s18, 1024, %s778_s4, [#allocation7], %s662_s25, %s662_s25, %s663_s26  }
 0x1cd   :  { %659 = dma.done.wait [#allocation7], 1024  }
 0x1ce   :  { %660 = vsyncadd [#allocation7], 4294966272 }
 0x1cf   :  { %455 = vsyncpa [#allocation6], 1 }
 0x1d0   :  { %456 = vsyncpa [#allocation9], 1 }
 0x1d1   :  { %457 = vsyncpa [#allocation7], 1 }

</bundles_post_ra>
